<compile_context>
chip_gen: v7x
topology: tpu7x:2x2x1
jax: 0.10.0
libtpu: 0.0.40
codegen_flags: <defaults>
</compile_context>

<pallas_src>
import functools

import jax
import jax.numpy as jnp
import numpy as np
from jax import lax
from jax.experimental import pallas as pl
from jax.experimental.pallas import tpu as pltpu

MIN_NORM = 1e-15          # clamp for squared norms (matches the reference)
BALL_EPS = 1e-5           # keep artanh arguments strictly inside the unit ball


def _artanh(x):
    x = jnp.clip(x, -1.0 + BALL_EPS, 1.0 - BALL_EPS)
    return 0.5 * jnp.log((1.0 + x) / (1.0 - x))


def _hyperbolic_tile_kernel(emb_q_ref, emb_k_ref, projT_ref, mobT_ref, out_ref,
                            *, matmul_dtype):
    """Computes one (TQ, TK) tile of the pairwise hyperbolic distance matrix."""
    projT = projT_ref[...]           # (D, Rp)   proj.T zero-padded to Rp lanes
    mobT = mobT_ref[...]             # (Rp, Rp)  mobius.T zero-padded
    rp = projT.shape[1]

    def transform(x):
        # x: (T, D)  ->  t: (T, Rp) point on the Poincare ball (curvature -1).
        p = jnp.dot(x.astype(matmul_dtype), projT.astype(matmul_dtype),
                    preferred_element_type=jnp.float32)
        p_sq = jnp.maximum(jnp.sum(p * p, axis=-1, keepdims=True), MIN_NORM)
        inv_pn = lax.rsqrt(p_sq)
        pn = p_sq * inv_pn                                   # ||p||
        y = jnp.tanh(pn) * p * inv_pn                        # expmap0
        my = jnp.dot(y.astype(matmul_dtype), mobT.astype(matmul_dtype),
                     preferred_element_type=jnp.float32)
        y_sq = jnp.maximum(jnp.sum(y * y, axis=-1, keepdims=True), MIN_NORM)
        my_sq = jnp.maximum(jnp.sum(my * my, axis=-1, keepdims=True), MIN_NORM)
        inv_yn = lax.rsqrt(y_sq)
        inv_myn = lax.rsqrt(my_sq)
        yn = y_sq * inv_yn                                   # ||y||
        myn = my_sq * inv_myn                                # ||yM^T||
        # mobius_matvec(M, y)
        return jnp.tanh(myn * inv_yn * _artanh(yn)) * my * inv_myn

    t_q = transform(emb_q_ref[0])    # (TQ, Rp)
    t_k = transform(emb_k_ref[0])    # (TK, Rp)

    # <t_i, t_j> as an NT matmul on the MXU (no explicit transpose of t_k).
    nt = (((1,), (1,)), ((), ()))
    gram = lax.dot_general(t_q, t_k, nt,
                           preferred_element_type=jnp.float32)          # (TQ, TK)
    sqi = jnp.sum(t_q * t_q, axis=-1, keepdims=True)                    # (TQ, 1)
    # Key-row squared norms, produced directly lane-major as (1, TK) via a
    # tiny ones-row matvec (avoids an XLU transpose of a (TK, 1) column).
    sqj = lax.dot_general(jnp.ones((1, rp), jnp.float32), t_k * t_k, nt,
                          preferred_element_type=jnp.float32)           # (1, TK)

    # Closed-form ||(-t_i) (+)_mobius t_j|| with the sign of <a,b> = -gram
    # folded into the constants (no negate pass):
    #   A     = 1 - 2*gram + ||t_j||^2         B = 1 - ||t_i||^2
    #   den   = 1 - 2*gram + ||t_i||^2 ||t_j||^2
    #   num^2 = A^2 ||t_i||^2 - 2 A B gram + B^2 ||t_j||^2
    A = 1.0 - 2.0 * gram + sqj
    Bc = 1.0 - sqi
    den = jnp.maximum(1.0 - 2.0 * gram + sqi * sqj, MIN_NORM)
    num_sq = (A * A) * sqi - 2.0 * (A * Bc) * gram + (Bc * Bc) * sqj
    r = jnp.sqrt(jnp.maximum(num_sq, 0.0))

    # dist = 2 * artanh(r / den) = log((den + r) / (den - r)):
    # a single divide replaces both /den and the divide inside artanh, and the
    # 2* / 0.5* constants cancel.  The max() reproduces artanh's 1 - eps clamp.
    ratio = (den + r) / jnp.maximum(den - r, BALL_EPS * den)
    out_ref[0] = jnp.log(ratio)


def _pick_tile(size, max_tile, multiple):
    """Largest divisor of `size` that is a multiple of `multiple` and <= max_tile;
    falls back to the whole axis if no such divisor exists (always legal)."""
    if size <= max_tile:
        return size
    t = (max_tile // multiple) * multiple
    while t >= multiple:
        if size % t == 0:
            return t
        t -= multiple
    return size


def hyperbolic_distance_probe(embeddings, proj, mobius, *,
                              tq_max=512, tk_max=512,
                              matmul_dtype=jnp.float32):
    """embeddings: (B, S, D); proj: (R, D); mobius: (R, R) -> (B, S, S) f32.

    tq_max / tk_max bound the (query, key) output tile: 512 fits comfortably in
    v7x's 64 MiB VMEM; on v5e/v6e (128 MiB) they can be raised to 1024.
    matmul_dtype=jnp.bfloat16 runs the two projection matmuls at native bf16
    MXU rate on v6e/v7x (Gram + epilogue always stay f32).
    """
    B, S, D = embeddings.shape
    R = proj.shape[0]

    # Pad the probe rank to a full 128-lane tile; padded columns are exactly
    # zero, so every norm, the Gram matrix and the distances are unchanged.
    Rp = max(128, ((R + 127) // 128) * 128)
    projT = jnp.zeros((D, Rp), jnp.float32).at[:, :R].set(
        jnp.asarray(proj, jnp.float32).T)
    mobT = jnp.zeros((Rp, Rp), jnp.float32).at[:R, :R].set(
        jnp.asarray(mobius, jnp.float32).T)

    # TK a multiple of 128 (lane-dense unmasked stores), TQ a multiple of 8,
    # unless the sequence is short enough to take whole.
    TQ = _pick_tile(S, tq_max, 8)
    TK = _pick_tile(S, tk_max, 128)
    nq = S // TQ
    nk = S // TK

    kernel = functools.partial(_hyperbolic_tile_kernel, matmul_dtype=matmul_dtype)

    cost = pl.CostEstimate(
        flops=int(B * S * S * (2 * Rp + 12)
                  + B * (nq + nk) * S * (2 * D * Rp + 2 * Rp * Rp + 16 * Rp)),
        transcendentals=int(B * S * S + 6 * B * (nq + nk) * S),
        bytes_accessed=int(4 * (B * S * S + B * S * D * (nq + nk)
                                + D * Rp + Rp * Rp)),
    )

    emb_f32 = jnp.asarray(embeddings, jnp.float32)
    return pl.pallas_call(
        kernel,
        out_shape=jax.ShapeDtypeStruct((B, S, S), jnp.float32),
        grid=(B, nq, nk),
        in_specs=[
            pl.BlockSpec((1, TQ, D), lambda b, qi, ki: (b, qi, 0)),   # query rows
            pl.BlockSpec((1, TK, D), lambda b, qi, ki: (b, ki, 0)),   # key rows
            pl.BlockSpec((D, Rp), lambda b, qi, ki: (0, 0)),
            pl.BlockSpec((Rp, Rp), lambda b, qi, ki: (0, 0)),
        ],
        out_specs=pl.BlockSpec((1, TQ, TK), lambda b, qi, ki: (b, qi, ki)),
        compiler_params=pltpu.CompilerParams(
            dimension_semantics=("parallel", "parallel", "parallel"),
            vmem_limit_bytes=64 * 1024 * 1024,
        ),
        cost_estimate=cost,
    )(emb_f32, emb_f32, projT, mobT)


def _reference(embeddings, proj, mobius):
    """Pure-JAX reference with the module's hyperbolic math (sanity check)."""
    p = embeddings @ proj.T
    pn = jnp.sqrt(jnp.maximum(jnp.sum(p * p, -1, keepdims=True), MIN_NORM))
    y = jnp.tanh(pn) * p / pn
    my = y @ mobius.T
    yn = jnp.sqrt(jnp.maximum(jnp.sum(y * y, -1, keepdims=True), MIN_NORM))
    myn = jnp.sqrt(jnp.maximum(jnp.sum(my * my, -1, keepdims=True), MIN_NORM))
    t = jnp.tanh((myn / yn) * _artanh(yn)) * my / myn
    gram = jnp.einsum("bik,bjk->bij", t, t)
    sq = jnp.sum(t * t, -1)
    sqi = sq[:, :, None]
    sqj = sq[:, None, :]
    A = 1.0 - 2.0 * gram + sqj
    Bc = 1.0 - sqi
    den = jnp.maximum(1.0 - 2.0 * gram + sqi * sqj, MIN_NORM)
    num_sq = A * A * sqi - 2.0 * A * Bc * gram + Bc * Bc * sqj
    m = jnp.sqrt(jnp.maximum(num_sq, 0.0)) / den
    return 2.0 * _artanh(m)


if __name__ == "__main__":
    B, S, D, R = 2, 8, 32, 16  # batch, seq_len, input_dim, probe_rank

    key = jax.random.PRNGKey(0)
    k_emb, k_proj, k_mob = jax.random.split(key, 3)

    embeddings = jax.random.normal(k_emb, (B, S, D), dtype=jnp.float32) * 0.5
    # nn.init.uniform_(..., -0.05, 0.05)
    proj = jax.random.uniform(k_proj, (R, D), jnp.float32, -0.05, 0.05)
    mobius = jax.random.uniform(k_mob, (R, R), jnp.float32, -0.05, 0.05)

    out = hyperbolic_distance_probe(embeddings, proj, mobius)
    out = jax.block_until_ready(out)

    ref = jax.block_until_ready(_reference(embeddings, proj, mobius))
    # Diagonal is analytically 0; kernel vs reference differ there only by
    # float accumulation-order noise (~1e-5), hence the absolute tolerance.
    np.testing.assert_allclose(np.asarray(out), np.asarray(ref),
                               rtol=1e-3, atol=5e-4)
    assert out.shape == (B, S, S)

    print("KERNEL_OK")
</pallas_src>

<mosaic_0001>
module attributes {stable_mosaic.version = 11 : i64} {
  func.func @_hyperbolic_tile_kernel(%arg0: i32, %arg1: i32, %arg2: i32, %arg3: memref<1x8x32xf32, #tpu.memory_space<vmem>>, %arg4: memref<1x8x32xf32, #tpu.memory_space<vmem>>, %arg5: memref<32x128xf32, #tpu.memory_space<vmem>>, %arg6: memref<128x128xf32, #tpu.memory_space<vmem>>, %arg7: memref<1x8x8xf32, #tpu.memory_space<vmem>>) attributes {dimension_semantics = [#tpu.dimension_semantics<parallel>, #tpu.dimension_semantics<parallel>, #tpu.dimension_semantics<parallel>], iteration_bounds = array<i64: 2, 1, 1>, scalar_prefetch = 0 : i64, scratch_operands = 0 : i64, tpu.core_type = #tpu.core_type<tc>, window_params = [{transform_indices = @transform_0, window_bounds = array<i64: 1, 8, 32>}, {transform_indices = @transform_1, window_bounds = array<i64: 1, 8, 32>}, {pipeline_mode = #tpu.pipeline_mode<synchronous>, transform_indices = @transform_2, window_bounds = array<i64: 32, 128>}, {pipeline_mode = #tpu.pipeline_mode<synchronous>, transform_indices = @transform_3, window_bounds = array<i64: 128, 128>}, {transform_indices = @transform_4, window_bounds = array<i64: 1, 8, 8>}]} {
    %c0 = arith.constant 0 : index
    %c0_0 = arith.constant 0 : index
    %0 = vector.load %arg5[%c0, %c0_0] : memref<32x128xf32, #tpu.memory_space<vmem>>, vector<32x128xf32>
    %c0_1 = arith.constant 0 : index
    %c0_2 = arith.constant 0 : index
    %1 = vector.load %arg6[%c0_1, %c0_2] : memref<128x128xf32, #tpu.memory_space<vmem>>, vector<128x128xf32>
    %c0_3 = arith.constant 0 : index
    %c0_4 = arith.constant 0 : index
    %c0_5 = arith.constant 0 : index
    %2 = vector.load %arg3[%c0_3, %c0_4, %c0_5] : memref<1x8x32xf32, #tpu.memory_space<vmem>>, vector<1x8x32xf32>
    %3 = vector.shape_cast %2 : vector<1x8x32xf32> to vector<8x32xf32>
    %cst = arith.constant dense<0.000000e+00> : vector<8x128xf32>
    %4 = tpu.matmul %3, %0, %cst {dimension_numbers = #tpu.dot_dimension_numbers<[1], [0], [0], [1], [0, 0, 1, 1], [], []>} : vector<8x32xf32>, vector<32x128xf32>, vector<8x128xf32> -> vector<8x128xf32>
    %5 = arith.mulf %4, %4 : vector<8x128xf32>
    %cst_6 = arith.constant dense<0.000000e+00> : vector<8xf32>
    %6 = vector.multi_reduction <add>, %5, %cst_6 [1] : vector<8x128xf32> to vector<8xf32>
    %7 = vector.shape_cast %6 : vector<8xf32> to vector<8x1xf32>
    %cst_7 = arith.constant 1.000000e-15 : f32
    %8 = vector.broadcast %cst_7 : f32 to vector<8x1xf32>
    %9 = arith.maximumf %7, %8 : vector<8x1xf32>
    %10 = math.rsqrt %9 : vector<8x1xf32>
    %11 = arith.mulf %9, %10 : vector<8x1xf32>
    %12 = math.tanh %11 : vector<8x1xf32>
    %13 = vector.broadcast %12 : vector<8x1xf32> to vector<8x128xf32>
    %14 = arith.mulf %13, %4 : vector<8x128xf32>
    %15 = vector.broadcast %10 : vector<8x1xf32> to vector<8x128xf32>
    %16 = arith.mulf %14, %15 : vector<8x128xf32>
    %cst_8 = arith.constant dense<0.000000e+00> : vector<8x128xf32>
    %17 = tpu.matmul %16, %1, %cst_8 {dimension_numbers = #tpu.dot_dimension_numbers<[1], [0], [0], [1], [0, 0, 1, 1], [], []>} : vector<8x128xf32>, vector<128x128xf32>, vector<8x128xf32> -> vector<8x128xf32>
    %18 = arith.mulf %16, %16 : vector<8x128xf32>
    %cst_9 = arith.constant dense<0.000000e+00> : vector<8xf32>
    %19 = vector.multi_reduction <add>, %18, %cst_9 [1] : vector<8x128xf32> to vector<8xf32>
    %20 = vector.shape_cast %19 : vector<8xf32> to vector<8x1xf32>
    %cst_10 = arith.constant 1.000000e-15 : f32
    %21 = vector.broadcast %cst_10 : f32 to vector<8x1xf32>
    %22 = arith.maximumf %20, %21 : vector<8x1xf32>
    %23 = arith.mulf %17, %17 : vector<8x128xf32>
    %cst_11 = arith.constant dense<0.000000e+00> : vector<8xf32>
    %24 = vector.multi_reduction <add>, %23, %cst_11 [1] : vector<8x128xf32> to vector<8xf32>
    %25 = vector.shape_cast %24 : vector<8xf32> to vector<8x1xf32>
    %cst_12 = arith.constant 1.000000e-15 : f32
    %26 = vector.broadcast %cst_12 : f32 to vector<8x1xf32>
    %27 = arith.maximumf %25, %26 : vector<8x1xf32>
    %28 = math.rsqrt %22 : vector<8x1xf32>
    %29 = math.rsqrt %27 : vector<8x1xf32>
    %30 = arith.mulf %22, %28 : vector<8x1xf32>
    %31 = arith.mulf %27, %29 : vector<8x1xf32>
    %32 = arith.mulf %31, %28 : vector<8x1xf32>
    %cst_13 = arith.constant -0.999989986 : f32
    %cst_14 = arith.constant 0.999989986 : f32
    %33 = vector.broadcast %cst_13 : f32 to vector<8x1xf32>
    %34 = arith.maximumf %33, %30 : vector<8x1xf32>
    %35 = vector.broadcast %cst_14 : f32 to vector<8x1xf32>
    %36 = arith.minimumf %35, %34 : vector<8x1xf32>
    %cst_15 = arith.constant 1.000000e+00 : f32
    %37 = vector.broadcast %cst_15 : f32 to vector<8x1xf32>
    %38 = arith.addf %37, %36 : vector<8x1xf32>
    %cst_16 = arith.constant 1.000000e+00 : f32
    %39 = vector.broadcast %cst_16 : f32 to vector<8x1xf32>
    %40 = arith.subf %39, %36 : vector<8x1xf32>
    %41 = arith.divf %38, %40 : vector<8x1xf32>
    %42 = math.log %41 : vector<8x1xf32>
    %cst_17 = arith.constant 5.000000e-01 : f32
    %43 = vector.broadcast %cst_17 : f32 to vector<8x1xf32>
    %44 = arith.mulf %43, %42 : vector<8x1xf32>
    %45 = arith.mulf %32, %44 : vector<8x1xf32>
    %46 = math.tanh %45 : vector<8x1xf32>
    %47 = vector.broadcast %46 : vector<8x1xf32> to vector<8x128xf32>
    %48 = arith.mulf %47, %17 : vector<8x128xf32>
    %49 = vector.broadcast %29 : vector<8x1xf32> to vector<8x128xf32>
    %50 = arith.mulf %48, %49 : vector<8x128xf32>
    %c0_18 = arith.constant 0 : index
    %c0_19 = arith.constant 0 : index
    %c0_20 = arith.constant 0 : index
    %51 = vector.load %arg4[%c0_18, %c0_19, %c0_20] : memref<1x8x32xf32, #tpu.memory_space<vmem>>, vector<1x8x32xf32>
    %52 = vector.shape_cast %51 : vector<1x8x32xf32> to vector<8x32xf32>
    %cst_21 = arith.constant dense<0.000000e+00> : vector<8x128xf32>
    %53 = tpu.matmul %52, %0, %cst_21 {dimension_numbers = #tpu.dot_dimension_numbers<[1], [0], [0], [1], [0, 0, 1, 1], [], []>} : vector<8x32xf32>, vector<32x128xf32>, vector<8x128xf32> -> vector<8x128xf32>
    %54 = arith.mulf %53, %53 : vector<8x128xf32>
    %cst_22 = arith.constant dense<0.000000e+00> : vector<8xf32>
    %55 = vector.multi_reduction <add>, %54, %cst_22 [1] : vector<8x128xf32> to vector<8xf32>
    %56 = vector.shape_cast %55 : vector<8xf32> to vector<8x1xf32>
    %cst_23 = arith.constant 1.000000e-15 : f32
    %57 = vector.broadcast %cst_23 : f32 to vector<8x1xf32>
    %58 = arith.maximumf %56, %57 : vector<8x1xf32>
    %59 = math.rsqrt %58 : vector<8x1xf32>
    %60 = arith.mulf %58, %59 : vector<8x1xf32>
    %61 = math.tanh %60 : vector<8x1xf32>
    %62 = vector.broadcast %61 : vector<8x1xf32> to vector<8x128xf32>
    %63 = arith.mulf %62, %53 : vector<8x128xf32>
    %64 = vector.broadcast %59 : vector<8x1xf32> to vector<8x128xf32>
    %65 = arith.mulf %63, %64 : vector<8x128xf32>
    %cst_24 = arith.constant dense<0.000000e+00> : vector<8x128xf32>
    %66 = tpu.matmul %65, %1, %cst_24 {dimension_numbers = #tpu.dot_dimension_numbers<[1], [0], [0], [1], [0, 0, 1, 1], [], []>} : vector<8x128xf32>, vector<128x128xf32>, vector<8x128xf32> -> vector<8x128xf32>
    %67 = arith.mulf %65, %65 : vector<8x128xf32>
    %cst_25 = arith.constant dense<0.000000e+00> : vector<8xf32>
    %68 = vector.multi_reduction <add>, %67, %cst_25 [1] : vector<8x128xf32> to vector<8xf32>
    %69 = vector.shape_cast %68 : vector<8xf32> to vector<8x1xf32>
    %cst_26 = arith.constant 1.000000e-15 : f32
    %70 = vector.broadcast %cst_26 : f32 to vector<8x1xf32>
    %71 = arith.maximumf %69, %70 : vector<8x1xf32>
    %72 = arith.mulf %66, %66 : vector<8x128xf32>
    %cst_27 = arith.constant dense<0.000000e+00> : vector<8xf32>
    %73 = vector.multi_reduction <add>, %72, %cst_27 [1] : vector<8x128xf32> to vector<8xf32>
    %74 = vector.shape_cast %73 : vector<8xf32> to vector<8x1xf32>
    %cst_28 = arith.constant 1.000000e-15 : f32
    %75 = vector.broadcast %cst_28 : f32 to vector<8x1xf32>
    %76 = arith.maximumf %74, %75 : vector<8x1xf32>
    %77 = math.rsqrt %71 : vector<8x1xf32>
    %78 = math.rsqrt %76 : vector<8x1xf32>
    %79 = arith.mulf %71, %77 : vector<8x1xf32>
    %80 = arith.mulf %76, %78 : vector<8x1xf32>
    %81 = arith.mulf %80, %77 : vector<8x1xf32>
    %cst_29 = arith.constant -0.999989986 : f32
    %cst_30 = arith.constant 0.999989986 : f32
    %82 = vector.broadcast %cst_29 : f32 to vector<8x1xf32>
    %83 = arith.maximumf %82, %79 : vector<8x1xf32>
    %84 = vector.broadcast %cst_30 : f32 to vector<8x1xf32>
    %85 = arith.minimumf %84, %83 : vector<8x1xf32>
    %cst_31 = arith.constant 1.000000e+00 : f32
    %86 = vector.broadcast %cst_31 : f32 to vector<8x1xf32>
    %87 = arith.addf %86, %85 : vector<8x1xf32>
    %cst_32 = arith.constant 1.000000e+00 : f32
    %88 = vector.broadcast %cst_32 : f32 to vector<8x1xf32>
    %89 = arith.subf %88, %85 : vector<8x1xf32>
    %90 = arith.divf %87, %89 : vector<8x1xf32>
    %91 = math.log %90 : vector<8x1xf32>
    %cst_33 = arith.constant 5.000000e-01 : f32
    %92 = vector.broadcast %cst_33 : f32 to vector<8x1xf32>
    %93 = arith.mulf %92, %91 : vector<8x1xf32>
    %94 = arith.mulf %81, %93 : vector<8x1xf32>
    %95 = math.tanh %94 : vector<8x1xf32>
    %96 = vector.broadcast %95 : vector<8x1xf32> to vector<8x128xf32>
    %97 = arith.mulf %96, %66 : vector<8x128xf32>
    %98 = vector.broadcast %78 : vector<8x1xf32> to vector<8x128xf32>
    %99 = arith.mulf %97, %98 : vector<8x128xf32>
    %cst_34 = arith.constant dense<0.000000e+00> : vector<8x8xf32>
    %100 = tpu.matmul %50, %99, %cst_34 {dimension_numbers = #tpu.dot_dimension_numbers<[1], [1], [0], [0], [0, 0, 1, 0], [], []>} : vector<8x128xf32>, vector<8x128xf32>, vector<8x8xf32> -> vector<8x8xf32>
    %101 = arith.mulf %50, %50 : vector<8x128xf32>
    %cst_35 = arith.constant dense<0.000000e+00> : vector<8xf32>
    %102 = vector.multi_reduction <add>, %101, %cst_35 [1] : vector<8x128xf32> to vector<8xf32>
    %103 = vector.shape_cast %102 : vector<8xf32> to vector<8x1xf32>
    %cst_36 = arith.constant 1.000000e+00 : f32
    %104 = vector.broadcast %cst_36 : f32 to vector<1x128xf32>
    %105 = arith.mulf %99, %99 : vector<8x128xf32>
    %cst_37 = arith.constant dense<0.000000e+00> : vector<1x8xf32>
    %106 = tpu.matmul %104, %105, %cst_37 {dimension_numbers = #tpu.dot_dimension_numbers<[1], [1], [0], [0], [0, 0, 1, 0], [], []>} : vector<1x128xf32>, vector<8x128xf32>, vector<1x8xf32> -> vector<1x8xf32>
    %cst_38 = arith.constant 2.000000e+00 : f32
    %107 = vector.broadcast %cst_38 : f32 to vector<8x8xf32>
    %108 = arith.mulf %107, %100 : vector<8x8xf32>
    %cst_39 = arith.constant 1.000000e+00 : f32
    %109 = vector.broadcast %cst_39 : f32 to vector<8x8xf32>
    %110 = arith.subf %109, %108 : vector<8x8xf32>
    %111 = vector.broadcast %106 : vector<1x8xf32> to vector<8x8xf32>
    %112 = arith.addf %110, %111 : vector<8x8xf32>
    %cst_40 = arith.constant 1.000000e+00 : f32
    %113 = vector.broadcast %cst_40 : f32 to vector<8x1xf32>
    %114 = arith.subf %113, %103 : vector<8x1xf32>
    %cst_41 = arith.constant 2.000000e+00 : f32
    %115 = vector.broadcast %cst_41 : f32 to vector<8x8xf32>
    %116 = arith.mulf %115, %100 : vector<8x8xf32>
    %cst_42 = arith.constant 1.000000e+00 : f32
    %117 = vector.broadcast %cst_42 : f32 to vector<8x8xf32>
    %118 = arith.subf %117, %116 : vector<8x8xf32>
    %119 = vector.broadcast %103 : vector<8x1xf32> to vector<8x8xf32>
    %120 = vector.broadcast %106 : vector<1x8xf32> to vector<8x8xf32>
    %121 = arith.mulf %119, %120 : vector<8x8xf32>
    %122 = arith.addf %118, %121 : vector<8x8xf32>
    %cst_43 = arith.constant 1.000000e-15 : f32
    %123 = vector.broadcast %cst_43 : f32 to vector<8x8xf32>
    %124 = arith.maximumf %122, %123 : vector<8x8xf32>
    %125 = arith.mulf %112, %112 : vector<8x8xf32>
    %126 = vector.broadcast %103 : vector<8x1xf32> to vector<8x8xf32>
    %127 = arith.mulf %125, %126 : vector<8x8xf32>
    %128 = vector.broadcast %114 : vector<8x1xf32> to vector<8x8xf32>
    %129 = arith.mulf %112, %128 : vector<8x8xf32>
    %cst_44 = arith.constant 2.000000e+00 : f32
    %130 = vector.broadcast %cst_44 : f32 to vector<8x8xf32>
    %131 = arith.mulf %130, %129 : vector<8x8xf32>
    %132 = arith.mulf %131, %100 : vector<8x8xf32>
    %133 = arith.subf %127, %132 : vector<8x8xf32>
    %134 = arith.mulf %114, %114 : vector<8x1xf32>
    %135 = vector.broadcast %134 : vector<8x1xf32> to vector<8x8xf32>
    %136 = vector.broadcast %106 : vector<1x8xf32> to vector<8x8xf32>
    %137 = arith.mulf %135, %136 : vector<8x8xf32>
    %138 = arith.addf %133, %137 : vector<8x8xf32>
    %cst_45 = arith.constant 0.000000e+00 : f32
    %139 = vector.broadcast %cst_45 : f32 to vector<8x8xf32>
    %140 = arith.maximumf %138, %139 : vector<8x8xf32>
    %141 = math.sqrt %140 : vector<8x8xf32>
    %142 = arith.addf %124, %141 : vector<8x8xf32>
    %143 = arith.subf %124, %141 : vector<8x8xf32>
    %cst_46 = arith.constant 9.99999974E-6 : f32
    %144 = vector.broadcast %cst_46 : f32 to vector<8x8xf32>
    %145 = arith.mulf %144, %124 : vector<8x8xf32>
    %146 = arith.maximumf %143, %145 : vector<8x8xf32>
    %147 = arith.divf %142, %146 : vector<8x8xf32>
    %148 = math.log %147 : vector<8x8xf32>
    %c0_47 = arith.constant 0 : index
    %c0_48 = arith.constant 0 : index
    %c0_49 = arith.constant 0 : index
    %149 = vector.load %arg7[%c0_47, %c0_48, %c0_49] : memref<1x8x8xf32, #tpu.memory_space<vmem>>, vector<1x8x8xf32>
    %150 = vector.shape_cast %149 : vector<1x8x8xf32> to vector<8x8xf32>
    %151 = vector.shape_cast %148 : vector<8x8xf32> to vector<1x8x8xf32>
    tpu.vector_store %arg7[%c0_47, %c0_48, %c0_49], %151 {strides = array<i32>} : memref<1x8x8xf32, #tpu.memory_space<vmem>>, vector<1x8x8xf32>,
    return
  }
  func.func @transform_0(%arg0: i32, %arg1: i32, %arg2: i32) -> (i32, i32, i32) {
    %c0_i32 = arith.constant 0 : i32
    %c0_i32_0 = arith.constant 0 : i32
    return %arg0, %arg1, %c0_i32 : i32, i32, i32
  }
  func.func @transform_1(%arg0: i32, %arg1: i32, %arg2: i32) -> (i32, i32, i32) {
    %c0_i32 = arith.constant 0 : i32
    %c0_i32_0 = arith.constant 0 : i32
    return %arg0, %arg2, %c0_i32 : i32, i32, i32
  }
  func.func @transform_2(%arg0: i32, %arg1: i32, %arg2: i32) -> (i32, i32) {
    %c0_i32 = arith.constant 0 : i32
    %c0_i32_0 = arith.constant 0 : i32
    %c0_i32_1 = arith.constant 0 : i32
    return %c0_i32, %c0_i32_0 : i32, i32
  }
  func.func @transform_3(%arg0: i32, %arg1: i32, %arg2: i32) -> (i32, i32) {
    %c0_i32 = arith.constant 0 : i32
    %c0_i32_0 = arith.constant 0 : i32
    %c0_i32_1 = arith.constant 0 : i32
    return %c0_i32, %c0_i32_0 : i32, i32
  }
  func.func @transform_4(%arg0: i32, %arg1: i32, %arg2: i32) -> (i32, i32, i32) {
    %c0_i32 = arith.constant 0 : i32
    return %arg0, %arg1, %arg2 : i32, i32, i32
  }
}

</mosaic_0001>

<bundles_post_ra>
// kernel: tpu_custom_call.1
= control target key start
LH: loop header
LB: loop body
LE: loop exit
PB: predicated region body
PF: predicated region fallthrough
CT: control target
= control target key end

     0   :  { %s1957_s0 = inlined_call_operand.hbm [shape: f32[2,8,32], index: 0, kind: input, shape index: {}]   ;;  %s1958_s1 = inlined_call_operand.hbm [shape: f32[2,8,32], index: 1, kind: input, shape index: {}]   ;;  %s1959_s2 = inlined_call_operand.hbm [shape: f32[32,128], index: 2, kind: input, shape index: {}]   ;;  %s1960_s3 = inlined_call_operand.hbm [shape: f32[128,128], index: 3, kind: input, shape index: {}]   ;;  %s1961_s4 = inlined_call_operand.hbm [shape: f32[2,8,8], index: 4, kind: output, shape index: {}]  }
   0x1   :  { %1967 = sst [smem:[#allocation17_spill]] %s1959_s2 }
   0x2   :  { %1968 = sst [smem:[#allocation18_spill]] %s1960_s3 }
   0x3   :  { %9 = vsyncpa [#allocation3], 0 }
   0x4   :  { %11 = vsyncpa [#allocation3 + $0x1], 0 }
   0x5   :  { %12 = vsyncpa [#allocation6], 0 }
   0x6   :  { %14 = vsyncpa [#allocation6 + $0x1], 0 }
   0x7   :  { %15 = vsyncpa [#allocation9], 0 }
   0x8   :  { %16 = vsyncpa [#allocation4], 0 }
   0x9   :  { %18 = vsyncpa [#allocation4 + $0x1], 0  ;;  %s1622_s15 = smov 0   ;;  %s1624_s16 = smov 0  }
   0xa   :  { %s1626_s17 = smov 0   ;;  %s1628_s18 = smov 0  }
   0xb   :  { %s1630_s19 = smov 0   ;;  %s1632_s20 = smov 0  }
   0xc LB: > { %s1653_s21 = sadd.s32 4294967295, %s1584_s20   ;;  %s1013_s22 = sadd.s32 4294967294, %s1584_s20   ;;  %s1584_s20 = sphi %s1632_s20, %s24_s20   ;;  %s1580_s19 = sphi %s1630_s19, %s1993_s19   ;;  %s1576_s18 = sphi %s1628_s18, %s1992_s18   ;;  %s1572_s17 = sphi %s1626_s17, %s1991_s17   ;;  %s1568_s16 = sphi %s1624_s16, %s1990_s16   ;;  %s1564_s15 = sphi %s1622_s15, %s1989_s15  }
   0xd   : > { %p65_p0 = scmp.ne.s32.totalorder %s1568_s16, %s1564_s15  ;;  %p1962_p1 = scmp.eq.s32.totalorder %s1653_s21, 0 }
   0xe   : > { %p169_p3 = scmp.eq.s32.totalorder %s1013_s22, 1  ;;  %p1014_p5 = scmp.ge.s32.totalorder %s1584_s20, 1 }
   0xf   : > { %p1662_p4 = por %p1962_p1, %p65_p0  ;;  %p176_p7 = scmp.lt.s32.totalorder %s1584_s20, 3 }
  0x10   : > { %p1667_p6 = por %p169_p3, %p65_p0  ;;  %s1586_s26 = smov [#allocation7]  }
  0x11   : > { %s1969_s23 = scalar_select %p1662_p4, 1, 0 }
  0x12   : > { %s1970_s24 = scalar_select %p1667_p6, 1, 0 }
  0x13   : > { %p1672_p8 = pnand %p1014_p5, %p176_p7  ;;  %s188_s27 = sshll.u32 %s1586_s26, 4  ;;  %s1676_s27 = int_to_ptr.vmem [resolvable:$true] %s188_s27 }
  0x14   : > { %s1587_s29 = smov [#allocation8]   ;;  %s1973_s2 = sld [smem:[#allocation17_spill]] }
  0x15   : > { %s1971_s25 = scalar_select %p1672_p8, 1, 0 }
  0x16   : > { %p1260_p9 = pneg %p1672_p8  ;;  %s201_s30 = sshll.u32 %s1587_s29, 4  ;;  %s1687_s30 = int_to_ptr.vmem [resolvable:$true] %s201_s30 }
  0x18   : > { %p1683_p11 = pnand %p1260_p9, %p1962_p1 }
  0x1a   : > { %s1374_s7 = scalar_lea.hbm %s1973_s2, 512  ;;  %p1376_p13 = pneg %p1683_p11 }
  0x1b   : > { %p1375_p12 = scmp.ne.s32.totalorder %s1973_s2, %s1374_s7  ;;  %p1381_p5 = scmp.lt.u32.totalorder %s1374_s7, %s1973_s2 }
  0x1d   : > { %p1377_p0 = pnand %p1376_p13, %p1375_p12 }
  0x1f   : > { %p1378_p3 = pneg %p1377_p0 }
  0x21   : > { %p1383_p7 = pnand %p1381_p5, %p1378_p3 }
  0x23   : > { %1386 = shalt.err (!%p1383_p7)
}
  0x24   : > { %s1387_s12 = scalar_lea.vmem %s1676_s27, 512  ;;  %p1395_p2 = scmp.lt.s32.totalorder %s1676_s27, %s1676_s27 }
  0x25   : > { %p1388_p9 = scmp.ne.s32.totalorder %s1676_s27, %s1387_s12  ;;  %p1396_p12 = scmp.lt.s32.totalorder %s1387_s12, %s1387_s12 }
  0x27   : > { %p1390_p10 = pnand %p1388_p9, %p1376_p13  ;;  %p1397_p0 = por %p1396_p12, %p1395_p2 }
  0x29   : > { %p1391_p1 = pneg %p1390_p10 }
  0x2b   : > { %p1398_p6 = pnand %p1397_p0, %p1391_p1 }
  0x2d   : > { %1401 = shalt.err (!%p1398_p6)
}
  0x2e   : > { %s1588_s13 = smov 128   ;;  %s1589_s14 = smov 8  }
  0x2f   : > { %1263 = dma.hbm_to_vmem [thread:$0]  (!%p1683_p11), %s1973_s2, 512, %s1676_s27, [#allocation6], %s1588_s13, %s1588_s13, %s1589_s14  }
  0x30   : > { %s1974_s3 = sld [smem:[#allocation18_spill]] }
  0x36   : > { %s1402_s6 = scalar_lea.hbm %s1974_s3, 2048 }
  0x37   : > { %p1403_p2 = scmp.ne.s32.totalorder %s1974_s3, %s1402_s6  ;;  %p1409_p10 = scmp.lt.u32.totalorder %s1402_s6, %s1974_s3 }
  0x39   : > { %p1405_p1 = pnand %p1403_p2, %p1376_p13 }
  0x3b   : > { %p1406_p6 = pneg %p1405_p1 }
  0x3d   : > { %p1411_p3 = pnand %p1409_p10, %p1406_p6 }
  0x3f   : > { %1414 = shalt.err (!%p1411_p3)
}
  0x40   : > { %s1415_s27 = scalar_lea.vmem %s1687_s30, 2048  ;;  %p1423_p12 = scmp.lt.s32.totalorder %s1687_s30, %s1687_s30 }
  0x41   : > { %p1416_p5 = scmp.ne.s32.totalorder %s1687_s30, %s1415_s27  ;;  %p1424_p0 = scmp.lt.s32.totalorder %s1415_s27, %s1415_s27 }
  0x43   : > { %p1418_p7 = pnand %p1416_p5, %p1376_p13  ;;  %p1425_p2 = por %p1424_p0, %p1423_p12 }
  0x45   : > { %p1419_p9 = pneg %p1418_p7 }
  0x47   : > { %p1426_p1 = pnand %p1425_p2, %p1419_p9 }
  0x49   : > { %1429 = shalt.err (!%p1426_p1)
}
  0x4a   : > { %1266 = dma.hbm_to_vmem [thread:$0]  (!%p1683_p11), %s1974_s3, 2048, %s1687_s30, [#allocation9], %s1588_s13, %s1588_s13, %s1589_s14  }
  0x4b   : > { %s43_s22 = sadd.s32 1, %s1580_s19  ;;  %s52_s26 = sadd.s32 1, %s1572_s17 }
  0x4c   : > { %p45_p13 = scmp.ge.s32.totalorder %s43_s22, 2  ;;  %p59_p6 = scmp.ne.s32.totalorder %s1572_s17, %s1568_s16 }
  0x4d   : > { %p60_p10 = scmp.eq.s32.totalorder %s1584_s20, 0  ;;  %p1280_p3 = scmp.lt.s32.totalorder %s1584_s20, 2 }
  0x4e   : > { %s1995_s22 = smov (%p45_p13, %s43_s22), 0  ;;  %p1976_p7 = scmp.eq.s32.totalorder %s1653_s21, 1 }
  0x4f   : > { %1975 = sst [smem:[#allocation16_spill]] %s1995_s22  ;;  %p61_p5 = por %p60_p10, %p59_p6 }
  0x50   : > { %p1751_p9 = por %p1976_p7, %p59_p6  ;;  %s47_s29 = ssub.s32 %s1580_s19, %s1995_s22 }
  0x51   : > { %s215_s5 = sand.u32 1, %s1572_s17   ;;  %p50_p12 = scmp.eq.s32.totalorder %s47_s29, 0 }
  0x52   : > { %s1977_s28 = scalar_select %p1751_p9, 1, 0 }
  0x53   : > { %s1758_s30 = sshll.u32 %s215_s5, 3  ;;  %s1019_s13 = sshll.u32 %s1580_s19, 7 }
  0x54   : > { %s1762_s14 = scalar_select %p50_p12, %s1572_s17, %s52_s26  }
  0x55   : > { %s1767_s8 = scalar_lea.hbm %s1957_s0, %s1019_s13  ;;  %s219_s9 = scalar_lea.vmem [#allocation2], %s1758_s30 }
  0x56   : > { %s227_s10 = sshll.u32 %s219_s9, 4  ;;  %p1772_p11 = pnand %p1280_p3, %p61_p5  ;;  %s1776_s10 = int_to_ptr.vmem [resolvable:$true] %s227_s10 }
  0x57   : > { %s1781_s26 = scalar_lea.hbm %s1958_s1, %s1019_s13  ;;  %s216_s29 = scalar_lea.sflag [#allocation3], %s215_s5 }
  0x58   : > { %s1430_s6 = scalar_lea.hbm %s1767_s8, 128  ;;  %p1432_p2 = pneg %p1772_p11 }
  0x59   : > { %p1431_p0 = scmp.ne.s32.totalorder %s1767_s8, %s1430_s6  ;;  %s1435_s2 = scalar_lea.hbm %s1957_s0, 256 }
  0x5a   : > { %p1436_p6 = scmp.lt.u32.totalorder %s1767_s8, %s1957_s0  ;;  %p1437_p10 = scmp.lt.u32.totalorder %s1435_s2, %s1430_s6 }
  0x5b   : > { %p1433_p1 = pnand %p1432_p2, %p1431_p0  ;;  %p1439_p5 = scmp.lt.u32.totalorder %s1430_s6, %s1767_s8 }
  0x5c   : > { %p1438_p3 = por %p1437_p10, %p1436_p6 }
  0x5d   : > { %p1434_p13 = pneg %p1433_p1 }
  0x5e   : > { %p1440_p7 = por %p1439_p5, %p1438_p3 }
  0x60   : > { %p1441_p12 = pnand %p1440_p7, %p1434_p13 }
  0x62   : > { %1444 = shalt.err (!%p1441_p12)
}
  0x63   : > { %s1445_s5 = scalar_lea.vmem %s1776_s10, 128  ;;  %s1590_s13 = smov [#allocation2]  }
  0x64   : > { %p1446_p0 = scmp.ne.s32.totalorder %s1776_s10, %s1445_s5  ;;  %s1450_s11 = sshll.u32 %s1590_s13, 4  ;;  %s1451_s11 = int_to_ptr.vmem [resolvable:$false] %s1450_s11 }
  0x65   : > { %s1452_s3 = scalar_lea.vmem %s1451_s11, 256  ;;  %p1453_p4 = scmp.lt.s32.totalorder %s1776_s10, %s1451_s11 }
  0x66   : > { %p1448_p1 = pnand %p1446_p0, %p1432_p2  ;;  %p1454_p6 = scmp.lt.s32.totalorder %s1452_s3, %s1445_s5 }
  0x68   : > { %p1449_p9 = pneg %p1448_p1  ;;  %p1455_p10 = por %p1454_p6, %p1453_p4 }
  0x6a   : > { %p1456_p3 = pnand %p1455_p10, %p1449_p9 }
  0x6c   : > { %1459 = shalt.err (!%p1456_p3)
}
  0x6d   : > { %1270 = dma.hbm_to_vmem [thread:$0]  (!%p1772_p11), %s1767_s8, 128, %s1776_s10, %s216_s29  }
  0x6e   : > { %s234_s2 = sand.u32 1, %s1584_s20   ;;  %s238_s22 = scalar_lea.vmem [#allocation5], %s1758_s30 }
  0x6f   : > { %s246_s12 = sshll.u32 %s238_s22, 4  ;;  %s235_s6 = scalar_lea.sflag [#allocation6], %s234_s2  ;;  %s247_s12 = int_to_ptr.vmem [resolvable:$true] %s246_s12 }
  0x70   : > { %s1460_s7 = scalar_lea.hbm %s1781_s26, 128  ;;  %s1465_s13 = scalar_lea.hbm %s1958_s1, 256 }
  0x71   : > { %p1461_p4 = scmp.ne.s32.totalorder %s1781_s26, %s1460_s7  ;;  %p1466_p5 = scmp.lt.u32.totalorder %s1781_s26, %s1958_s1 }
  0x72   : > { %p1467_p7 = scmp.lt.u32.totalorder %s1465_s13, %s1460_s7  ;;  %p1469_p0 = scmp.lt.u32.totalorder %s1460_s7, %s1781_s26 }
  0x73   : > { %p1463_p9 = pnand %p1461_p4, %p1432_p2 }
  0x74   : > { %p1468_p12 = por %p1467_p7, %p1466_p5 }
  0x75   : > { %p1464_p13 = pneg %p1463_p9 }
  0x76   : > { %p1470_p1 = por %p1469_p0, %p1468_p12 }
  0x78   : > { %p1471_p6 = pnand %p1470_p1, %p1464_p13 }
  0x7a   : > { %1474 = shalt.err (!%p1471_p6)
}
  0x7b   : > { %s1475_s30 = scalar_lea.vmem %s247_s12, 128  ;;  %s1591_s8 = smov [#allocation5]  }
  0x7c   : > { %p1476_p10 = scmp.ne.s32.totalorder %s247_s12, %s1475_s30  ;;  %s1480_s10 = sshll.u32 %s1591_s8, 4  ;;  %s1481_s10 = int_to_ptr.vmem [resolvable:$false] %s1480_s10 }
  0x7d   : > { %s1482_s29 = scalar_lea.vmem %s1481_s10, 256  ;;  %p1483_p9 = scmp.lt.s32.totalorder %s247_s12, %s1481_s10 }
  0x7e   : > { %p1478_p3 = pnand %p1476_p10, %p1432_p2  ;;  %p1484_p8 = scmp.lt.s32.totalorder %s1482_s29, %s1475_s30 }
  0x80   : > { %p1479_p4 = pneg %p1478_p3  ;;  %p1485_p5 = por %p1484_p8, %p1483_p9 }
  0x82   : > { %p1486_p7 = pnand %p1485_p5, %p1479_p4 }
  0x84   : > { %1489 = shalt.err (!%p1486_p7)
}
  0x85   : > { %1273 = dma.hbm_to_vmem [thread:$0]  (!%p1772_p11), %s1781_s26, 128, %s247_s12, %s235_s6  }
  0x86   : > { %p1979_p13 = scmp.ne.s32.totalorder %s1971_s25, 0 }
  0x87   : > { %s1832_s2 = sand.u32 (!%p1979_p13), 1, %s1568_s16   ;;  %p1980_p8 = scmp.ne.s32.totalorder (!%p1979_p13), %s1969_s23, 0 }
  0x88   : > { %255 = sbr.rel (%p1979_p13) target bundleno = 1244 (0x4dc), region = 36  ;;  %s1835_s22 = sshll.u32 (!%p1979_p13), %s1832_s2, 3 }
  0x89   : > { %s258_s7 = scalar_lea.sflag (!%p1979_p13), [#allocation3], %s1832_s2  ;;  %s261_s9 = scalar_lea.vmem (!%p1979_p13), [#allocation2], %s1835_s22 }
  0x8f   : > { %1543 = dma.done.wait (%p1980_p8), %s258_s7, 128  }
  0x90   : > { %1545 = vsyncadd (%p1980_p8), %s258_s7, 4294967168  ;;  %s266_s25 = sand.u32 1, %s1653_s21   ;;  %s270_s26 = scalar_lea.vmem [#allocation5], %s1835_s22 }
  0x91   : > { %s267_s27 = scalar_lea.sflag [#allocation6], %s266_s25 }
  0x92   : > { %1547 = dma.done.wait (%p1980_p8), %s267_s27, 128  }
  0x93   : > { %1549 = vsyncadd (%p1980_p8), %s267_s27, 4294967168  ;;  %p1981_p11 = scmp.eq.s32.totalorder %s1653_s21, 0 }
  0x95   : > { %1551 = dma.done.wait (%p1981_p11), [#allocation6], 512   ;;  %p1982_p2 = pmov %p1981_p11 }
  0x97   : > { %1553 = vsyncadd (%p1982_p2), [#allocation6], 4294966784  ;;  %p1983_p12 = pmov %p1982_p2 }
  0x98   : > { %p1984_p0 = pmov %p1982_p2 }
  0x99   : > { %1555 = dma.done.wait (%p1983_p12), [#allocation9], 2048  }
  0x9a   : > { %1557 = vsyncadd (%p1984_p0), [#allocation9], 4294965248  ;;  %v1592_v0 = vmov 0.0|0.0   ;;  %vm1593_vm0 = vmmov 0   ;;  %v1594_v1 = vmov 0.0   ;;  %v308_v2 = vld [vmem:[#allocation7] sm:$0xff] }
  0x9b   : > { %1186 = vmatprep.subr.bf16.mxu0 %v1592_v0  ;;  %1092 = vmatprep.mubr.msk.f32.mxu0 %vm1593_vm0, %v1594_v1  ;;  %v309_v3 = vld [vmem:[#allocation7 + $0x8] sm:$0xff]  ;;  %v310_v4 = vld [vmem:[#allocation7 + $0x10] sm:$0xff]  ;;  %v311_v6 = vld [vmem:[#allocation7 + $0x18] sm:$0xff]  ;;  %vm329_vm1 = vcmask 261120   ;;  %s1033_s21 = sshll.u32 %s1576_s18, 7  ;;  %s307_s23 = scalar_lea.vmem [#allocation10], %s1835_s22 }
  0x9c   : > { %1192 = vmatprep.subr.bf16.mxu1 %v1592_v0  ;;  %1127 = vmatprep.mubr.msk.f32.mxu1 %vm1593_vm0, %v1594_v1  ;;  %v1187_v5 = vpack.c.bf16 %v309_v3, %v308_v2  ;;  %v1190_v7 = vpack.c.bf16 %v311_v6, %v310_v4  ;;  %v328_v8 = vld [vmem:[%s261_s9] sm:$0xff]  ;;  %v508_v9 = vld [vmem:[%s270_s26] sm:$0xff]  ;;  %s885_s12 = sshll.u32 %s307_s23, 4  ;;  %vm867_vm4 = vcmask 64512   ;;  %s1908_s13 = scalar_lea.hbm %s1961_s4, %s1033_s21  ;;  %s1910_s12 = int_to_ptr.vmem [resolvable:$true] %s885_s12 }
  0x9d   : > { %v312_v10 = vld [vmem:[#allocation8] sm:$0xff]  ;;  %v313_v11 = vld [vmem:[#allocation8 + $0x8] sm:$0xff]  ;;  %v314_v19 = vld [vmem:[#allocation8 + $0x10] sm:$0xff]  ;;  %s870_s11 = scalar_lea.sflag [#allocation4], %s1832_s2  ;;  %s1490_s3 = scalar_lea.vmem %s1910_s12, 128 }
  0x9e   : > { %1188 = vmatpush3.bf16.msra.mxu0 %v1187_v5  ;;  %v1193_v12 = vpack.c.bf16 %v313_v11, %v312_v10  ;;  %v315_v20 = vld [vmem:[#allocation8 + $0x18] sm:$0xff]  ;;  %v316_v22 = vld [vmem:[#allocation8 + $0x20] sm:$0xff]  ;;  %v317_v23 = vld [vmem:[#allocation8 + $0x28] sm:$0xff]  ;;  %p1491_p1 = scmp.ne.s32.totalorder %s1910_s12, %s1490_s3  ;;  %p1985_p6 = scmp.ne.s32.totalorder %s1977_s28, 0 }
  0x9f   : > { %1189 = vmatprep.subr.bf16.mxu0 %v1592_v0  ;;  %v1196_v21 = vpack.c.bf16 %v315_v20, %v314_v19  ;;  %v1199_v24 = vpack.c.bf16 %v317_v23, %v316_v22  ;;  %v318_v25 = vld [vmem:[#allocation8 + $0x30] sm:$0xff]  ;;  %v319_v26 = vld [vmem:[#allocation8 + $0x38] sm:$0xff]  ;;  %v320_v28 = vld [vmem:[#allocation8 + $0x40] sm:$0xff]  ;;  %s1596_s18 = smov [#allocation10]  }
  0xa0   : > { %1194 = vmatpush3.bf16.msra.mxu1 %v1193_v12  ;;  %v1202_v27 = vpack.c.bf16 %v319_v26, %v318_v25  ;;  %v321_v29 = vld [vmem:[#allocation8 + $0x48] sm:$0xff]  ;;  %v322_v31 = vld [vmem:[#allocation8 + $0x50] sm:$0xff]  ;;  %v323_v32 = vld [vmem:[#allocation8 + $0x58] sm:$0xff]  ;;  %p1492_p10 = pnand %p1491_p1, %p1985_p6  ;;  %s1494_s30 = sshll.u32 %s1596_s18, 4  ;;  %s1495_s30 = int_to_ptr.vmem [resolvable:$false] %s1494_s30 }
  0xa1   : > { %1195 = vmatprep.subr.bf16.mxu1 %v1592_v0  ;;  %v1205_v30 = vpack.c.bf16 %v321_v29, %v320_v28  ;;  %v1208_v33 = vpack.c.bf16 %v323_v32, %v322_v31  ;;  %v324_v34 = vld [vmem:[#allocation8 + $0x60] sm:$0xff]  ;;  %v325_v35 = vld [vmem:[#allocation8 + $0x68] sm:$0xff]  ;;  %v326_v37 = vld [vmem:[#allocation8 + $0x70] sm:$0xff]  ;;  %s1496_s8 = scalar_lea.vmem %s1495_s30, 256  ;;  %p1497_p4 = scmp.lt.s32.totalorder %s1910_s12, %s1495_s30 }
  0xa2   : > { %1191 = vmatpush3.bf16.msra.mxu0 %v1190_v7  ;;  %v1211_v36 = vpack.c.bf16 %v325_v35, %v324_v34  ;;  %v327_v38 = vld [vmem:[#allocation8 + $0x78] sm:$0xff]  ;;  %p1493_p3 = pneg %p1492_p10  ;;  %p1498_p9 = scmp.lt.s32.totalorder %s1496_s8, %s1490_s3 }
  0xa3   : > { %1216 = vmatprep.subr.bf16.mxu0 %v1592_v0  ;;  %v1214_v39 = vpack.c.bf16 %v327_v38, %v326_v37 }
  0xa4   : > { %1197 = vmatpush3.bf16.msra.mxu1 %v1196_v21  ;;  %p1499_p5 = por %p1498_p9, %p1497_p4 }
  0xa5   : > { %1093 = vmatmul.mubr.msk.f32.vlgmr.msra.gmra.mrb[0].mxu0 %vm329_vm1, %v328_v8  ;;  %1198 = vmatprep.subr.bf16.mxu1 %v1592_v0 }
  0xa6   : > { %1218 = vmatpush3.bf16.msra.mxu0 %v1187_v5  ;;  %1138 = vmatprep.mubr.msk.f32.mxu0 %vm1593_vm0, %v1594_v1  ;;  %p1500_p7 = pnand %p1499_p5, %p1493_p3 }
  0xa7   : > { %1219 = vmatprep.subr.bf16.mxu0 %v1592_v0 }
  0xa8   : > { %1200 = vmatpush3.bf16.msra.mxu1 %v1199_v24 }
  0xa9   : > { %1201 = vmatprep.subr.bf16.mxu1 %v1592_v0 }
  0xaa   : > { %1221 = vmatpush3.bf16.msra.mxu0 %v1190_v7 }
  0xab   : > { %1222 = vmatprep.subr.bf16.mxu0 %v1592_v0 }
  0xac   : > { %1203 = vmatpush3.bf16.msra.mxu1 %v1202_v27 }
  0xad   : > { %1139 = vmatmul.mubr.msk.f32.vlgmr.msra.gmra.mrb[2].mxu0 %vm329_vm1, %v508_v9  ;;  %1204 = vmatprep.subr.bf16.mxu1 %v1592_v0 }
  0xae   : > { %1173 = vmatprep.mubr.msk.f32.mxu0 %vm1593_vm0, %v1594_v1  ;;  %1224 = vmatpush3.bf16.msra.mxu0 %v1193_v12 }
  0xaf   : > { %1225 = vmatprep.subr.bf16.mxu0 %v1592_v0 }
  0xb0   : > { %1206 = vmatpush3.bf16.msra.mxu1 %v1205_v30 }
  0xb1   : > { %1207 = vmatprep.subr.bf16.mxu1 %v1592_v0 }
  0xb2   : > { %1227 = vmatpush3.bf16.msra.mxu0 %v1196_v21 }
  0xb3   : > { %1228 = vmatprep.subr.bf16.mxu0 %v1592_v0 }
  0xb4   : > { %1209 = vmatpush3.bf16.msra.mxu1 %v1208_v33 }
  0xb5   : > { %1210 = vmatprep.subr.bf16.mxu1 %v1592_v0 }
  0xb6   : > { %1230 = vmatpush3.bf16.msra.mxu0 %v1199_v24 }
  0xb7   : > { %1231 = vmatprep.subr.bf16.mxu0 %v1592_v0 }
  0xb8   : > { %1212 = vmatpush3.bf16.msra.mxu1 %v1211_v36 }
  0xb9   : > { %1213 = vmatprep.subr.bf16.mxu1 %v1592_v0 }
  0xba   : > { %1233 = vmatpush3.bf16.msra.mxu0 %v1202_v27 }
  0xbb   : > { %1234 = vmatprep.subr.bf16.mxu0 %v1592_v0 }
  0xbc   : > { %1215 = vmatpush3.bf16.msra.mxu1 %v1214_v39 }
  0xbd   : > { %1176 = vmatprep.subr.mxu1 %v1594_v1 }
  0xbe   : > { %1236 = vmatpush3.bf16.msra.mxu0 %v1205_v30 }
  0xbf   : > { %1237 = vmatprep.subr.bf16.mxu0 %v1592_v0 }
  0xc2   : > { %1239 = vmatpush3.bf16.msra.mxu0 %v1208_v33 }
  0xc3   : > { %1240 = vmatprep.subr.bf16.mxu0 %v1592_v0 }
  0xc6   : > { %1242 = vmatpush3.bf16.msra.mxu0 %v1211_v36 }
  0xc7   : > { %1243 = vmatprep.subr.bf16.mxu0 %v1592_v0 }
  0xca   : > { %1245 = vmatpush3.bf16.msra.mxu0 %v1214_v39 }
 0x178   : > { %v1875_v13 = vpop.f32.mrb[0].mxu0 }
 0x179   : > { %v1094_v14 = vpop.f32.mrb[1].mxu0  ;;  %v403_v18 = vmul.f32 %v1875_v13, %v1875_v13 }
 0x180   : > { %v1877_v15 = vpop.f32.mrb[2].mxu0 }
 0x181   : > { %v1140_v16 = vpop.f32.mrb[3].mxu0  ;;  %v582_v17 = vmul.f32 %v1877_v15, %v1877_v15 }
 0x183   : > { %583 = vadd.xlane.f32.xlu0 %v582_v17 }
 0x187   : > { %404 = vadd.xlane.f32.xlu0 %v403_v18 }
 0x210   : > { %v584_v40 = vpop.xlane.xlu0 %583 }
 0x211   : > { %v585_v41 = vmax.f32 %v584_v40, 1e-15 }
 0x213   : > { %1340 = vrsqrt.f32 %v585_v41 }
 0x214   : > { %v405_v42 = vpop.xlane.xlu0 %404 }
 0x215   : > { %v406_v43 = vmax.f32 %v405_v42, 1e-15 }
 0x217   : > { %1342 = vrsqrt.f32 %v406_v43 }
 0x21d   : > { %v1341_v44 = vpop.eup %1340 }
 0x21e   : > { %v587_v45 = vmul.f32 %v1341_v44, %v585_v41 }
 0x220   : > { %1344 = vtanh.f32 %v587_v45 }
 0x221   : > { %v1343_v46 = vpop.eup %1342 }
 0x222   : > { %v408_v47 = vmul.f32 %v1343_v46, %v406_v43  ;;  %v1595_v43 = vmov 1.0  }
 0x224   : > { %1346 = vtanh.f32 %v408_v47 }
 0x22a   : > { %v1345_v48 = vpop.eup %1344 }
 0x22b   : > { %v589_v49 = vmul.f32 %v1345_v48, %v1877_v15 }
 0x22d   : > { %v590_v50 = vmul.f32 %v1341_v44, %v589_v49  ;;  %v833_v44 = vlaneseq }
 0x22e   : > { %v1347_v51 = vpop.eup %1346 }
 0x22f   : > { %1174 = vmatmul.mubr.f32.vlgmr.msra.gmra.mrb[4].mxu0 %v590_v50  ;;  %v661_v52 = vmul.f32 %v590_v50, %v590_v50  ;;  %v410_v53 = vmul.f32 %v1347_v51, %v1875_v13  ;;  %v834_v45 = vshrl.u32 %v833_v44, 7 }
 0x231   : > { %662 = vadd.xlane.f32.xlu1 %v661_v52  ;;  %v411_v54 = vmul.f32 %v1343_v46, %v410_v53  ;;  %v835_v49 = vsub.s32 0, %v834_v45 }
 0x233   : > { %1128 = vmatmul.mubr.f32.vlgmr.msra.gmra.mrb[0].mxu1 %v411_v54  ;;  %v482_v55 = vmul.f32 %v411_v54, %v411_v54 }
 0x234   : > { %1178 = vmatprep.mubr.msk.f32.mxu1 %vm1593_vm0, %v1594_v1 }
 0x235   : > { %483 = vadd.xlane.f32.xlu1 %v482_v55 }
 0x2be   : > { %v663_v62 = vpop.xlane.xlu1 %662 }
 0x2bf   : > { %v664_v63 = vmax.f32 %v663_v62, 1e-15 }
 0x2c1   : > { %1348 = vrsqrt.f32 %v664_v63 }
 0x2c2   : > { %v484_v0 = vpop.xlane.xlu1 %483 }
 0x2c3   : > { %v485_v2 = vmax.f32 %v484_v0, 1e-15 }
 0x2c5   : > { %1350 = vrsqrt.f32 %v485_v2 }
 0x2cb   : > { %v1349_v3 = vpop.eup %1348 }
 0x2cc   : > { %v671_v5 = vmul.f32 %v1349_v3, %v664_v63 }
 0x2ce   : > { %v1031_v7 = vclamps-f32 %v671_v5, 0.99999 }
 0x2cf   : > { %v1351_v4 = vpop.eup %1350 }
 0x2d0   : > { %v492_v6 = vmul.f32 %v1351_v4, %v485_v2  ;;  %v677_v9 = vsub.f32 1.0, %v1031_v7  ;;  %v676_v12 = vadd.f32 1.0, %v1031_v7 }
 0x2d2   : > { %v1029_v8 = vclamps-f32 %v492_v6, 0.99999  ;;  %1352 = vrcp.f32 %v677_v9 }
 0x2d4   : > { %v498_v10 = vsub.f32 1.0, %v1029_v8  ;;  %v497_v15 = vadd.f32 1.0, %v1029_v8 }
 0x2d6   : > { %1354 = vrcp.f32 %v498_v10 }
 0x2dc   : > { %v1353_v11 = vpop.eup %1352 }
 0x2dd   : > { %v679_v14 = vmul.f32 %v1353_v11, %v676_v12 }
 0x2df   : > { %1356 = vlog2.f32 %v679_v14 }
 0x2e0   : > { %v1355_v13 = vpop.eup %1354 }
 0x2e1   : > { %v500_v16 = vmul.f32 %v1355_v13, %v497_v15 }
 0x2e3   : > { %1358 = vlog2.f32 %v500_v16 }
 0x2e9   : > { %v1357_v21 = vpop.eup %1356 }
 0x2ea   : > { %v681_v23 = vmul.f32 0.6931472, %v1357_v21 }
 0x2ec   : > { %v682_v26 = vmul.f32 0.5, %v681_v23 }
 0x2ed   : > { %v1359_v22 = vpop.eup %1358 }
 0x2ee   : > { %v502_v28 = vmul.f32 0.6931472, %v1359_v22 }
 0x2f0   : > { %v503_v32 = vmul.f32 0.5, %v502_v28 }
 0x302   : > { %v657_v56 = vpop.f32.mrb[4].mxu0 }
 0x303   : > { %v1175_v57 = vpop.f32.mrb[5].mxu0  ;;  %v665_v58 = vmul.f32 %v657_v56, %v657_v56 }
 0x305   : > { %666 = vadd.xlane.f32.xlu0 %v665_v58 }
 0x306   : > { %v478_v59 = vpop.f32.mrb[0].mxu1 }
 0x307   : > { %v1129_v60 = vpop.f32.mrb[1].mxu1  ;;  %v486_v61 = vmul.f32 %v478_v59, %v478_v59 }
 0x309   : > { %487 = vadd.xlane.f32.xlu1 %v486_v61 }
 0x392   : > { %v667_v17 = vpop.xlane.xlu0 %666 }
 0x393   : > { %v668_v18 = vmax.f32 %v667_v17, 1e-15 }
 0x395   : > { %1360 = vrsqrt.f32 %v668_v18 }
 0x396   : > { %v488_v19 = vpop.xlane.xlu1 %487 }
 0x397   : > { %v489_v20 = vmax.f32 %v488_v19, 1e-15 }
 0x399   : > { %1362 = vrsqrt.f32 %v489_v20 }
 0x39f   : > { %v1361_v24 = vpop.eup %1360 }
 0x3a0   : > { %v672_v25 = vmul.f32 %v1361_v24, %v668_v18 }
 0x3a2   : > { %v673_v27 = vmul.f32 %v1349_v3, %v672_v25 }
 0x3a3   : > { %v1363_v29 = vpop.eup %1362 }
 0x3a4   : > { %v683_v30 = vmul.f32 %v682_v26, %v673_v27  ;;  %v493_v31 = vmul.f32 %v1363_v29, %v489_v20 }
 0x3a6   : > { %1364 = vtanh.f32 %v683_v30  ;;  %v494_v33 = vmul.f32 %v1351_v4, %v493_v31 }
 0x3a8   : > { %v504_v34 = vmul.f32 %v503_v32, %v494_v33 }
 0x3aa   : > { %1366 = vtanh.f32 %v504_v34 }
 0x3b0   : > { %v1365_v35 = vpop.eup %1364 }
 0x3b1   : > { %v685_v36 = vmul.f32 %v1365_v35, %v657_v56 }
 0x3b3   : > { %v686_v37 = vmul.f32 %v1361_v24, %v685_v36 }
 0x3b4   : > { %v1367_v38 = vpop.eup %1366 }
 0x3b5   : > { %1177 = vmatpush3.xpose.msra.mxu1 %v686_v37  ;;  %v506_v39 = vmul.f32 %v1367_v38, %v478_v59  ;;  %v760_v41 = vmul.f32 %v686_v37, %v686_v37 }
 0x3b6   : > { %1181 = vmatprep.subr.mxu1 %v1594_v1 }
 0x3b7   : > { %v507_v40 = vmul.f32 %v1363_v29, %v506_v39 }
 0x3b9   : > { %1179 = vmatmul.mubr.f32.vlgmr.msra.gmra.mrb[2].mxu1 %v507_v40  ;;  %v757_v42 = vmul.f32 %v507_v40, %v507_v40 }
 0x3ba   : > { %1182 = vmatpush3.xpose.msra.mxu1 %v760_v41  ;;  %1183 = vmatprep.mubr.msk.f32.mxu1 %vm1593_vm0, %v1594_v1 }
 0x3bb   : > { %758 = vadd.xlane.f32.xlu0 %v757_v42 }
 0x3bd   : > { %1184 = vmatmul.mubr.f32.vlgmr.msra.gmra.mrb[4].mxu1 %v1595_v43 }
 0x448   : > { %v759_v50 = vpop.xlane.xlu0 %758 }
 0x449   : > { %v838_v55 = vsub.f32 1.0, %v759_v50 }
 0x44b   : > { %v848_v61 = vmul.f32 %v838_v55, %v838_v55 }
 0x48c   : > { %v753_v46 = vpop.f32.mrb[2].mxu1 }
 0x48d   : > { %v831_v47 = vmul.f32 2.0, %v753_v46  ;;  %v1180_v48 = vpop.f32.mrb[3].mxu1 }
 0x48f   : > { %v832_v52 = vsub.f32 1.0, %v831_v47 }
 0x490   : > { %v827_v51 = vpop.f32.mrb[4].mxu1 }
 0x491   : > { %v836_v53 = vrot.slane %v827_v51, %v835_v49  ;;  %v1185_v54 = vpop.f32.mrb[5].mxu1 }
 0x493   : > { %v837_v56 = vadd.f32 %v836_v53, %v832_v52  ;;  %v839_v57 = vmul.f32 %v836_v53, %v759_v50  ;;  %v849_v2 = vmul.f32 %v848_v61, %v836_v53 }
 0x495   : > { %v840_v58 = vadd.f32 %v839_v57, %v832_v52  ;;  %v842_v59 = vmul.f32 %v837_v56, %v837_v56  ;;  %v844_v1 = vmul.f32 %v838_v55, %v837_v56 }
 0x497   : > { %v845_v60 = vmul.f32 2.0, %v844_v1  ;;  %v843_v62 = vmul.f32 %v842_v59, %v759_v50  ;;  %v841_v6 = vmax.f32 %v840_v58, 1e-15 }
 0x499   : > { %v846_v63 = vmul.f32 %v845_v60, %v753_v46  ;;  %v861_v13 = vmul.f32 1e-05, %v841_v6 }
 0x49b   : > { %v847_v0 = vsub.f32 %v843_v62, %v846_v63 }
 0x49d   : > { %v850_v3 = vadd.f32 %v849_v2, %v847_v0 }
 0x49f   : > { %v851_v4 = vmax.f32 %v850_v3, 0.0 }
 0x4a1   : > { %1368 = vrsqrt.f32 %v851_v4  ;;  %vm854_vm2 = vcmp.eq.f32.partialorder %v851_v4, inf  ;;  %v857_v8 = vand.u32 2147483648, %v851_v4  ;;  %vm856_vm3 = vcmp.eq.f32.partialorder %v851_v4, 0.0 }
 0x4ab   : > { %v1369_v5 = vpop.eup %1368 }
 0x4ac   : > { %v853_v7 = vmul.f32 %v1369_v5, %v851_v4 }
 0x4ae   : > { %v855_v9 = vsel %vm854_vm2, %v851_v4, %v853_v7 }
 0x4af   : > { %v858_v10 = vsel %vm856_vm3, %v857_v8, %v855_v9 }
 0x4b0   : > { %v859_v11 = vadd.f32 %v858_v10, %v841_v6  ;;  %v860_v12 = vsub.f32 %v841_v6, %v858_v10 }
 0x4b2   : > { %v862_v14 = vmax.f32 %v860_v12, %v861_v13 }
 0x4b4   : > { %1370 = vrcp.f32 %v862_v14 }
 0x4be   : > { %v1371_v15 = vpop.eup %1370 }
 0x4bf   : > { %v864_v16 = vmul.f32 %v1371_v15, %v859_v11 }
 0x4c1   : > { %1372 = vlog2.f32 %v864_v16 }
 0x4cb   : > { %v1373_v17 = vpop.eup %1372 }
 0x4cc   : > { %v866_v18 = vmul.f32 0.6931472, %v1373_v17 }
 0x4ce   : > { %868 = vst.msk [vmem:[%s307_s23] sm:$0xff] %vm867_vm4, %v866_v18 }
 0x4cf   : > { %1503 = shalt.err (!%p1500_p7)
}
 0x4d0   : > { %s1504_s10 = scalar_lea.hbm %s1908_s13, 128  ;;  %s1508_s22 = scalar_lea.hbm %s1961_s4, 256 }
 0x4d1   : > { %p1505_p13 = scmp.ne.s32.totalorder %s1908_s13, %s1504_s10  ;;  %p1509_p2 = scmp.lt.u32.totalorder %s1908_s13, %s1961_s4 }
 0x4d2   : > { %p1510_p12 = scmp.lt.u32.totalorder %s1508_s22, %s1504_s10  ;;  %p1512_p1 = scmp.lt.u32.totalorder %s1504_s10, %s1908_s13 }
 0x4d3   : > { %p1506_p8 = pnand %p1505_p13, %p1985_p6 }
 0x4d4   : > { %p1511_p0 = por %p1510_p12, %p1509_p2 }
 0x4d5   : > { %p1507_p11 = pneg %p1506_p8 }
 0x4d6   : > { %p1513_p10 = por %p1512_p1, %p1511_p0 }
 0x4d8   : > { %p1514_p3 = pnand %p1513_p10, %p1507_p11 }
 0x4da   : > { %1517 = shalt.err (!%p1514_p3)
}
 0x4db   : > { %1258 = dma.vmem_to_hbm [thread:$0]  (%p1985_p6), %s1910_s12, 128, %s1908_s13, %s870_s11  }
 0x4dc PF: > { %s897_s25 = sand.u32 1, %s1564_s15   ;;  %p1986_p4 = scmp.ne.s32.totalorder %s1970_s24, 0 }
 0x4dd   : > { %p1987_p9 = scmp.ge.s32.totalorder %s1584_s20, 2  ;;  %s898_s27 = scalar_lea.sflag [#allocation4], %s897_s25 }
 0x4df   : > { %p1275_p5 = pnand %p1987_p9, %p1986_p4 }
 0x4e1   : > { %1559 = dma.done.wait (!%p1275_p5), %s898_s27, 128  }
 0x4e2   : > { %1561 = vsyncadd (!%p1275_p5), %s898_s27, 4294967168  ;;  %s24_s20 = sadd.s32 1, %s1584_s20   ;;  %s1988_s28 = sld [smem:[#allocation16_spill]] }
 0x4e3   : > { %p21_p7 = scmp.ge.s32.totalorder %s24_s20, 4   ;;  %s1989_s15 = smov %s1568_s16 }
 0x4e4   : > { %s1990_s16 = smov %s1572_s17  ;;  %s1991_s17 = smov %s1762_s14 }
 0x4e5   : > { %s1992_s18 = smov %s1580_s19  ;;  %23 = sbr.rel (!%p21_p7) target bundleno = 12 (0xc), region = 102 }
 0x4e8   : > { %s1993_s19 = smov %s1988_s28 }
 0x4ec   :  { %903 = vsyncpa [#allocation3], 1 }
 0x4ed   :  { %905 = vsyncpa [#allocation3 + $0x1], 1 }
 0x4ee   :  { %906 = vsyncpa [#allocation6], 1 }
 0x4ef   :  { %908 = vsyncpa [#allocation6 + $0x1], 1 }
 0x4f0   :  { %909 = vsyncpa [#allocation9], 1 }
 0x4f1   :  { %910 = vsyncpa [#allocation4], 1 }
 0x4f2   :  { %912 = vsyncpa [#allocation4 + $0x1], 1 }

</bundles_post_ra>
